<compile_context>
chip_gen: v5e
topology: v5e:2x2
jax: 0.10.0
libtpu: 0.0.40
codegen_flags: <defaults>
</compile_context>

<pallas_src>
import functools
import math

import jax
import jax.numpy as jnp
from jax import lax
from jax.experimental import pallas as pl
from jax.experimental.pallas import tpu as pltpu


def _round_up(x, m):
    return (x + m - 1) // m * m


def _last_block_kernel(x_ref, w_ref, gamma_ref, beta_ref, o_ref, acc_ref, *,
                       use_bn, num_groups, c_out, eps):
    # x_ref:     (tm, tk)    bf16
    # w_ref:     (tk, C_pad) bf16   (already transposed + scale-folded in wrapper)
    # gamma/beta:(1, C_pad)  f32
    # o_ref:     (tm, C_pad) f32
    # acc_ref:   (tm, C_pad) f32 scratch, persists across the K grid axis
    k = pl.program_id(1)

    @pl.when(k == 0)
    def _():
        acc_ref[...] = jnp.zeros_like(acc_ref)

    acc_ref[...] += jnp.dot(x_ref[...], w_ref[...],
                            preferred_element_type=jnp.float32)

    @pl.when(k == pl.num_programs(1) - 1)
    def _():
        y = acc_ref[...]                                   # (tm, C_pad) f32
        if use_bn:
            tm, c_pad = y.shape
            cg = c_out // num_groups
            g_pad = _round_up(num_groups, 128)             # lane-dense group axis
            # One-hot channel->group matrix; pad channels / pad groups are all-zero
            # rows / columns, so they never bias the statistics.
            ch = lax.broadcasted_iota(jnp.int32, (c_pad, g_pad), 0)
            gr = lax.broadcasted_iota(jnp.int32, (c_pad, g_pad), 1)
            onehot = jnp.where((ch < c_out) & (gr == ch // cg), 1.0, 0.0)

            # Group sums / sums-of-squares on the MXU (keeps the reduction off
            # the XLU lane axis); single-pass biased variance like torch.
            s1 = jnp.dot(y, onehot, preferred_element_type=jnp.float32)      # (tm, g_pad)
            s2 = jnp.dot(y * y, onehot, preferred_element_type=jnp.float32)  # (tm, g_pad)
            inv_cg = 1.0 / float(cg)
            mean = s1 * inv_cg
            var = s2 * inv_cg - mean * mean
            invstd = lax.rsqrt(var + eps)

            # Broadcast per-group stats back to channels (contract on group axis).
            dn = (((1,), (1,)), ((), ()))
            mean_b = lax.dot_general(mean, onehot, dn,
                                     preferred_element_type=jnp.float32)     # (tm, c_pad)
            invstd_b = lax.dot_general(invstd, onehot, dn,
                                       preferred_element_type=jnp.float32)   # (tm, c_pad)
            y = (y - mean_b) * invstd_b * gamma_ref[...] + beta_ref[...]
        o_ref[...] = y.astype(o_ref.dtype)


def last_block_forward(x_nchw, w, gamma, beta, *, scale=1.0, use_bn=False,
                       num_groups=8, eps=1e-5, tk=512):
    """x_nchw: (N, C, H, W); w: (C_out, K=C*H*W) like nn.Linear; gamma/beta: (C_out,)."""
    n = x_nchw.shape[0]
    x2 = x_nchw.reshape(n, -1).astype(jnp.float32)
    k = x2.shape[1]
    c_out = w.shape[0]
    if use_bn:
        assert c_out % num_groups == 0, "GroupNorm requires C_out % num_groups == 0"

    # Fold the wscale multiply into the weight once (trace-time constant); under
    # GroupNorm the scale cancels anyway, so this is exact in both modes.
    w_t = (w.astype(jnp.float32) * float(scale)).T          # (K, C_out)

    # Lane-dense / MXU-friendly padding.
    c_pad = _round_up(c_out, 128)
    tk = min(int(tk), _round_up(k, 128))
    k_pad = _round_up(k, tk)
    tm = min(128, _round_up(max(n, 1), 16))                 # bf16 sublane-friendly
    n_pad = _round_up(n, tm)

    x_p = jnp.zeros((n_pad, k_pad), jnp.bfloat16).at[:n, :k].set(x2.astype(jnp.bfloat16))
    w_p = jnp.zeros((k_pad, c_pad), jnp.bfloat16).at[:k, :c_out].set(w_t.astype(jnp.bfloat16))
    gamma_p = jnp.ones((1, c_pad), jnp.float32).at[0, :c_out].set(gamma.astype(jnp.float32))
    beta_p = jnp.zeros((1, c_pad), jnp.float32).at[0, :c_out].set(beta.astype(jnp.float32))

    grid = (n_pad // tm, k_pad // tk)

    # Explicit scoped-VMEM budget derived from the tiles (double-buffered in/out + acc).
    est = (2 * tm * tk * 2          # x tiles (bf16), double-buffered
           + 2 * tk * c_pad * 2     # w tiles (bf16), double-buffered
           + 2 * tm * c_pad * 4     # output tile (f32), double-buffered
           + tm * c_pad * 4         # accumulator
           + 4 * c_pad * 4)         # gamma/beta
    vmem_limit = int(min(max(4 * est, 16 * 1024 * 1024), 32 * 1024 * 1024))

    kernel = functools.partial(
        _last_block_kernel, use_bn=bool(use_bn), num_groups=int(num_groups),
        c_out=int(c_out), eps=float(eps))

    out_p = pl.pallas_call(
        kernel,
        out_shape=jax.ShapeDtypeStruct((n_pad, c_pad), jnp.float32),
        grid_spec=pltpu.PrefetchScalarGridSpec(
            num_scalar_prefetch=0,
            grid=grid,
            in_specs=[
                pl.BlockSpec((tm, tk), lambda i, kk: (i, kk)),      # x
                pl.BlockSpec((tk, c_pad), lambda i, kk: (kk, 0)),   # w (pre-transposed)
                pl.BlockSpec((1, c_pad), lambda i, kk: (0, 0)),     # gamma
                pl.BlockSpec((1, c_pad), lambda i, kk: (0, 0)),     # beta
            ],
            out_specs=pl.BlockSpec((tm, c_pad), lambda i, kk: (i, 0)),
            scratch_shapes=[pltpu.VMEM((tm, c_pad), jnp.float32)],
        ),
        compiler_params=pltpu.CompilerParams(
            dimension_semantics=("parallel", "arbitrary"),
            vmem_limit_bytes=vmem_limit,
        ),
    )(x_p, w_p, gamma_p, beta_p)

    return out_p[:n, :c_out]   # matches the final .view(N, C)


def _ref_forward(x_nchw, w, gamma, beta, *, scale, use_bn, num_groups=8, eps=1e-5,
                 matmul_dtype=jnp.float32):
    n = x_nchw.shape[0]
    xf = x_nchw.reshape(n, -1)
    wt = (w.astype(jnp.float32) * scale).T
    y = jnp.dot(xf.astype(matmul_dtype), wt.astype(matmul_dtype),
                preferred_element_type=jnp.float32)
    if use_bn:
        c = y.shape[1]
        cg = c // num_groups
        yg = y.reshape(n, num_groups, cg)
        m = yg.mean(-1, keepdims=True)
        v = ((yg - m) ** 2).mean(-1, keepdims=True)
        y = ((yg - m) / jnp.sqrt(v + eps)).reshape(n, c) * gamma + beta
    return y


if __name__ == "__main__":
    key = jax.random.PRNGKey(0)
    k_x, k_w, k_g, k_b = jax.random.split(key, 4)

    # Small shapes consistent with the module: NCHW input, flattened by forward.
    N, C_in, H, W = 2, 4, 16, 16        # in_features = 4*16*16 = 1024
    K = C_in * H * W
    C_out = 32                          # divisible by 8 (GroupNorm groups)

    x = jax.random.normal(k_x, (N, C_in, H, W), dtype=jnp.float32)
    # nn.Linear(in, out, bias=False) weight shape: (out, in).
    w = jax.random.normal(k_w, (C_out, K), dtype=jnp.float32) / math.sqrt(K)
    gamma = 1.0 + 0.1 * jax.random.normal(k_g, (C_out,), dtype=jnp.float32)
    beta = 0.1 * jax.random.normal(k_b, (C_out,), dtype=jnp.float32)

    # Case 1: defaults (use_wscale=False -> scale=1.0, use_bn=False -> Identity)
    out1 = last_block_forward(x, w, gamma, beta, scale=1.0, use_bn=False)
    jax.block_until_ready(out1)
    ref1_bf16 = _ref_forward(x, w, gamma, beta, scale=1.0, use_bn=False,
                             matmul_dtype=jnp.bfloat16)
    ref1_f32 = _ref_forward(x, w, gamma, beta, scale=1.0, use_bn=False)
    assert jnp.allclose(out1, ref1_bf16, atol=1e-3, rtol=1e-3)
    assert jnp.allclose(out1, ref1_f32, atol=1e-1)

    # Case 2: use_wscale=True (scale = wscale_gain / sqrt(in)), use_bn=True (GroupNorm(8))
    scale = 1.0 / math.sqrt(K)
    out2 = last_block_forward(x, w, gamma, beta, scale=scale, use_bn=True)
    jax.block_until_ready(out2)
    ref2_bf16 = _ref_forward(x, w, gamma, beta, scale=scale, use_bn=True,
                             matmul_dtype=jnp.bfloat16)
    ref2_f32 = _ref_forward(x, w, gamma, beta, scale=scale, use_bn=True)
    assert jnp.allclose(out2, ref2_bf16, atol=1e-3, rtol=1e-3)
    assert jnp.allclose(out2, ref2_f32, atol=1e-1)

    print("KERNEL_OK")
</pallas_src>

<mosaic_0001>
module attributes {stable_mosaic.version = 11 : i64} {
  func.func @_last_block_kernel(%arg0: i32, %arg1: i32, %arg2: memref<16x512xbf16, #tpu.memory_space<vmem>>, %arg3: memref<512x128xbf16, #tpu.memory_space<vmem>>, %arg4: memref<1x128xf32, #tpu.memory_space<vmem>>, %arg5: memref<1x128xf32, #tpu.memory_space<vmem>>, %arg6: memref<16x128xf32, #tpu.memory_space<vmem>>, %arg7: memref<16x128xf32, #tpu.memory_space<vmem>>) attributes {dimension_semantics = [#tpu.dimension_semantics<parallel>, #tpu.dimension_semantics<arbitrary>], iteration_bounds = array<i64: 1, 2>, scalar_prefetch = 0 : i64, scratch_operands = 1 : i64, tpu.core_type = #tpu.core_type<tc>, window_params = [{transform_indices = @transform_0, window_bounds = array<i64: 16, 512>}, {transform_indices = @transform_1, window_bounds = array<i64: 512, 128>}, {pipeline_mode = #tpu.pipeline_mode<synchronous>, transform_indices = @transform_2, window_bounds = array<i64: 1, 128>}, {pipeline_mode = #tpu.pipeline_mode<synchronous>, transform_indices = @transform_3, window_bounds = array<i64: 1, 128>}, {transform_indices = @transform_4, window_bounds = array<i64: 16, 128>}]} {
    %c0_i32 = arith.constant 0 : i32
    %0 = arith.cmpi eq, %arg1, %c0_i32 : i32
    %1 = arith.extui %0 : i1 to i32
    %c0_i32_0 = arith.constant 0 : i32
    %2 = arith.cmpi ne, %1, %c0_i32_0 : i32
    scf.if %2 {
      %cst_9 = arith.constant 0.000000e+00 : f32
      %12 = vector.broadcast %cst_9 : f32 to vector<16x128xf32>
      %c0_10 = arith.constant 0 : index
      %c0_11 = arith.constant 0 : index
      %13 = vector.load %arg7[%c0_10, %c0_11] : memref<16x128xf32, #tpu.memory_space<vmem>>, vector<16x128xf32>
      tpu.vector_store %arg7[%c0_10, %c0_11], %12 {strides = array<i32>} : memref<16x128xf32, #tpu.memory_space<vmem>>, vector<16x128xf32>,
    } else {
    }
    %c0 = arith.constant 0 : index
    %c0_1 = arith.constant 0 : index
    %3 = vector.load %arg7[%c0, %c0_1] : memref<16x128xf32, #tpu.memory_space<vmem>>, vector<16x128xf32>
    %c0_2 = arith.constant 0 : index
    %c0_3 = arith.constant 0 : index
    %4 = vector.load %arg2[%c0_2, %c0_3] : memref<16x512xbf16, #tpu.memory_space<vmem>>, vector<16x512xbf16>
    %c0_4 = arith.constant 0 : index
    %c0_5 = arith.constant 0 : index
    %5 = vector.load %arg3[%c0_4, %c0_5] : memref<512x128xbf16, #tpu.memory_space<vmem>>, vector<512x128xbf16>
    %cst = arith.constant dense<0.000000e+00> : vector<16x128xf32>
    %6 = tpu.matmul %4, %5, %cst {dimension_numbers = #tpu.dot_dimension_numbers<[1], [0], [0], [1], [0, 0, 1, 1], [], []>} : vector<16x512xbf16>, vector<512x128xbf16>, vector<16x128xf32> -> vector<16x128xf32>
    %7 = arith.addf %3, %6 : vector<16x128xf32>
    %c0_6 = arith.constant 0 : index
    %c0_7 = arith.constant 0 : index
    %8 = vector.load %arg7[%c0_6, %c0_7] : memref<16x128xf32, #tpu.memory_space<vmem>>, vector<16x128xf32>
    tpu.vector_store %arg7[%c0_6, %c0_7], %7 {strides = array<i32>} : memref<16x128xf32, #tpu.memory_space<vmem>>, vector<16x128xf32>,
    %c1_i32 = arith.constant 1 : i32
    %9 = arith.cmpi eq, %arg1, %c1_i32 : i32
    %10 = arith.extui %9 : i1 to i32
    %c0_i32_8 = arith.constant 0 : i32
    %11 = arith.cmpi ne, %10, %c0_i32_8 : i32
    scf.if %11 {
      %c0_9 = arith.constant 0 : index
      %c0_10 = arith.constant 0 : index
      %12 = vector.load %arg7[%c0_9, %c0_10] : memref<16x128xf32, #tpu.memory_space<vmem>>, vector<16x128xf32>
      %c0_11 = arith.constant 0 : index
      %c0_12 = arith.constant 0 : index
      %13 = vector.load %arg6[%c0_11, %c0_12] : memref<16x128xf32, #tpu.memory_space<vmem>>, vector<16x128xf32>
      tpu.vector_store %arg6[%c0_11, %c0_12], %12 {strides = array<i32>} : memref<16x128xf32, #tpu.memory_space<vmem>>, vector<16x128xf32>,
    } else {
    }
    return
  }
  func.func @transform_0(%arg0: i32, %arg1: i32) -> (i32, i32) {
    %c0_i32 = arith.constant 0 : i32
    return %arg0, %arg1 : i32, i32
  }
  func.func @transform_1(%arg0: i32, %arg1: i32) -> (i32, i32) {
    %c0_i32 = arith.constant 0 : i32
    %c0_i32_0 = arith.constant 0 : i32
    return %arg1, %c0_i32 : i32, i32
  }
  func.func @transform_2(%arg0: i32, %arg1: i32) -> (i32, i32) {
    %c0_i32 = arith.constant 0 : i32
    %c0_i32_0 = arith.constant 0 : i32
    %c0_i32_1 = arith.constant 0 : i32
    return %c0_i32, %c0_i32_0 : i32, i32
  }
  func.func @transform_3(%arg0: i32, %arg1: i32) -> (i32, i32) {
    %c0_i32 = arith.constant 0 : i32
    %c0_i32_0 = arith.constant 0 : i32
    %c0_i32_1 = arith.constant 0 : i32
    return %c0_i32, %c0_i32_0 : i32, i32
  }
  func.func @transform_4(%arg0: i32, %arg1: i32) -> (i32, i32) {
    %c0_i32 = arith.constant 0 : i32
    %c0_i32_0 = arith.constant 0 : i32
    return %arg0, %c0_i32 : i32, i32
  }
}

</mosaic_0001>

<bundles_post_ra>
// kernel: tpu_custom_call.1
= control target key start
LH: loop header
LB: loop body
LE: loop exit
PB: predicated region body
PF: predicated region fallthrough
CT: control target
= control target key end

     0   :  { %9 = vsyncpa [#allocation4], 0  ;;  %s1346_s0 = inlined_call_operand.hbm [shape: bf16[16,1024], index: 0, kind: input, shape index: {}]   ;;  %s1347_s1 = inlined_call_operand.hbm [shape: bf16[1024,128], index: 1, kind: input, shape index: {}]   ;;  %s1348_s2 = inlined_call_operand.vmem [shape: f32[1,128], index: 2, kind: input, shape index: {}]   ;;  %s1349_s3 = inlined_call_operand.vmem [shape: f32[1,128], index: 3, kind: input, shape index: {}]   ;;  %s1350_s4 = inlined_call_operand.hbm [shape: f32[16,128], index: 4, kind: output, shape index: {}]  }
   0x1   :  { %11 = vsyncpa [#allocation4 + $0x1], 0 }
   0x2   :  { %12 = vsyncpa [#allocation7], 0 }
   0x3   :  { %14 = vsyncpa [#allocation7 + $0x1], 0 }
   0x4   :  { %15 = vsyncpa [#allocation5], 0  ;;  %s1188_s15 = smov 0   ;;  %s1190_s16 = smov 0  }
   0x5   :  { %s1192_s17 = smov 0   ;;  %s1194_s18 = smov 0  }
   0x6   :  { %s1196_s2 = smov 0   ;;  %s1198_s19 = smov 0  }
   0x7 LB: > { %s731_s3 = sadd.s32 4294967295, %s1152_s19   ;;  %s30_s20 = sadd.s32 1, %s1148_s2  ;;  %s1152_s19 = sphi %s1198_s19, %s21_s19   ;;  %s1148_s2 = sphi %s1196_s2, %s1358_s2   ;;  %s1144_s18 = sphi %s1194_s18, %s1357_s18   ;;  %s1140_s17 = sphi %s1192_s17, %s1356_s17   ;;  %s1136_s16 = sphi %s1190_s16, %s1355_s16   ;;  %s1132_s15 = sphi %s1188_s15, %s1354_s15  }
   0x8   : > { %p31_p0 = scmp.ge.s32.totalorder %s30_s20, 2  ;;  %s42_s21 = sadd.s32 1, %s1140_s17 }
   0x9   : > { %p49_p1 = scmp.ne.s32.totalorder %s1140_s17, %s1136_s16  ;;  %p50_p2 = scmp.eq.s32.totalorder %s1152_s19, 0 }
   0xa   : > { %s1360_s20 = smov (%p31_p0, %s30_s20), 0  ;;  %p55_p4 = scmp.ne.s32.totalorder %s1136_s16, %s1132_s15 }
   0xb   : > { %p1224_p3 = por %p50_p2, %p49_p1  ;;  %s38_s23 = ssub.s32 %s1148_s2, %s1360_s20 }
   0xc   : > { %p56_p5 = scmp.eq.s32.totalorder %s731_s3, 0  ;;  %p40_p6 = scmp.eq.s32.totalorder %s38_s23, 0 }
   0xd   : > { %p946_p8 = scmp.lt.s32.totalorder %s1152_s19, 2  ;;  %s1242_s26 = sand.u32 1, %s1140_s17  }
   0xe   : > { %p1233_p7 = por %p56_p5, %p55_p4  ;;  %s893_s27 = sshll.u32 %s1148_s2, 4 }
   0xf   : > { %s1239_s25 = scalar_select %p40_p6, %s1140_s17, %s42_s21  }
  0x10   : > { %s734_s28 = sshll.u32 %s1242_s26, 5  ;;  %s191_s5 = scalar_lea.hbm %s1346_s0, %s893_s27 }
  0x11   : > { %s192_s6 = sshll.u32 %s191_s5, 4  ;;  %s183_s7 = scalar_lea.vmem [#allocation3], %s734_s28  ;;  %s193_s6 = int_to_ptr.hbm [resolvable:$true] %s192_s6 }
  0x12   : > { %s194_s8 = sshll.u32 %s183_s7, 4  ;;  %p1251_p9 = pnand %p946_p8, %p1224_p3  ;;  %s195_s8 = int_to_ptr.vmem [resolvable:$true] %s194_s8 }
  0x13   : > { %p740_p10 = scmp.ge.s32.totalorder %s1152_s19, 1  ;;  %s180_s10 = scalar_lea.sflag [#allocation4], %s1242_s26 }
  0x14   : > { %s1154_s11 = smov 512   ;;  %s1155_s12 = smov 256  }
  0x15   : > { %s1156_s13 = smov 16   ;;  %p224_p11 = scmp.lt.s32.totalorder %s1152_s19, 3 }
  0x16   : > { %942 = dma.hbm_to_vmem [thread:$0]  (!%p1251_p9), %s193_s6, 512, %s195_s8, %s180_s10, %s1154_s11, %s1155_s12, %s1156_s13  }
  0x17   : > { %s737_s14 = sshll.u32 %s1242_s26, 8  ;;  %s894_s15 = sshll.u32 %s1148_s2, 8 }
  0x18   : > { %p225_p12 = pnand %p740_p10, %p224_p11  ;;  %s213_s23 = scalar_lea.hbm %s1347_s1, %s894_s15 }
  0x19   : > { %s208_s27 = scalar_lea.vmem [#allocation6], %s737_s14  ;;  %s214_s29 = sshll.u32 %s213_s23, 4  ;;  %s215_s29 = int_to_ptr.hbm [resolvable:$true] %s214_s29 }
  0x1a   : > { %s216_s28 = sshll.u32 %s208_s27, 4  ;;  %s205_s30 = scalar_lea.sflag [#allocation7], %s1242_s26  ;;  %s217_s28 = int_to_ptr.vmem [resolvable:$true] %s216_s28 }
  0x1b   : > { %s1157_s5 = smov 64   ;;  %s1158_s7 = smov 4  }
  0x1c   : > { %945 = dma.hbm_to_vmem [thread:$0]  (!%p1251_p9), %s215_s29, 4096, %s217_s28, %s205_s30, %s1157_s5, %s1157_s5, %s1158_s7  }
  0x1d   : > { %228 = sbr.rel (%p225_p12) target bundleno = 243 (0xf3), region = 36  ;;  %s230_s6 = sand.u32 (!%p225_p12), 1, %s1136_s16  }
  0x1e   : > { %s741_s8 = sshll.u32 (!%p225_p12), %s230_s6, 5  ;;  %s231_s10 = scalar_lea.sflag (!%p225_p12), [#allocation4], %s230_s6 }
  0x1f   : > { %s1269_s11 = scalar_lea.vmem (!%p225_p12), [#allocation3], %s741_s8 }
  0x22   : > { %1119 = dma.done.wait (%p1233_p7), %s231_s10, 512  }
  0x23   : > { %1121 = vsyncadd (%p1233_p7), %s231_s10, 4294966784  ;;  %s742_s12 = sshll.u32 %s230_s6, 8  ;;  %s241_s26 = scalar_lea.sflag [#allocation7], %s230_s6 }
  0x24   : > { %s1275_s13 = scalar_lea.vmem [#allocation6], %s742_s12 }
  0x25   : > { %1123 = dma.done.wait (%p1233_p7), %s241_s26, 4096  }
  0x26   : > { %1125 = vsyncadd (%p1233_p7), %s241_s26, 4294963200  ;;  %p743_p13 = scmp.ne.s32.totalorder %s1144_s18, 0 }
  0x28   : > { %277 = sbr.rel (%p743_p13) target bundleno = 48 (0x30), region = 48 }
  0x2d   : > { %v1159_v0 = vmov 0.0  }
  0x2e   : > { %278 = vst [vmem:[#allocation2] sm:$0xff] %v1159_v0 }
  0x2f   : > { %279 = vst [vmem:[#allocation2 + $0x8] sm:$0xff] %v1159_v0 }
  0x30 PF: > { %v906_v1 = vld [vmem:[%s1275_s13 + $0x38] sm:$0xff]  ;;  %v905_v5 = vld [vmem:[%s1275_s13 + $0x30] sm:$0xff]  ;;  %v904_v9 = vld [vmem:[%s1275_s13 + $0x28] sm:$0xff]  ;;  %p888_p0 = scmp.ne.s32.totalorder %s1144_s18, 1 }
  0x31   : > { %v914_v2 = vld [vmem:[%s1275_s13 + $0x78] sm:$0xff]  ;;  %562 = vmatpush.bf16.msra.mxu0 %v906_v1  ;;  %v913_v6 = vld [vmem:[%s1275_s13 + $0x70] sm:$0xff]  ;;  %v912_v10 = vld [vmem:[%s1275_s13 + $0x68] sm:$0xff] }
  0x32   : > { %v922_v3 = vld [vmem:[%s1275_s13 + $0xb8] sm:$0xff]  ;;  %576 = vmatpush.bf16.msra.mxu1 %v914_v2  ;;  %v921_v7 = vld [vmem:[%s1275_s13 + $0xb0] sm:$0xff]  ;;  %v920_v11 = vld [vmem:[%s1275_s13 + $0xa8] sm:$0xff] }
  0x33   : > { %v930_v4 = vld [vmem:[%s1275_s13 + $0xf8] sm:$0xff]  ;;  %590 = vmatpush.bf16.msra.mxu2 %v922_v3  ;;  %v929_v8 = vld [vmem:[%s1275_s13 + $0xf0] sm:$0xff]  ;;  %v928_v12 = vld [vmem:[%s1275_s13 + $0xe8] sm:$0xff] }
  0x34   : > { %604 = vmatpush.bf16.msra.mxu3 %v930_v4  ;;  %v903_v13 = vld [vmem:[%s1275_s13 + $0x20] sm:$0xff]  ;;  %v902_v17 = vld [vmem:[%s1275_s13 + $0x18] sm:$0xff]  ;;  %v901_v21 = vld [vmem:[%s1275_s13 + $0x10] sm:$0xff] }
  0x35   : > { %563 = vmatpush.bf16.msra.mxu0 %v905_v5  ;;  %v911_v14 = vld [vmem:[%s1275_s13 + $0x60] sm:$0xff]  ;;  %v910_v18 = vld [vmem:[%s1275_s13 + $0x58] sm:$0xff]  ;;  %v909_v22 = vld [vmem:[%s1275_s13 + $0x50] sm:$0xff] }
  0x36   : > { %577 = vmatpush.bf16.msra.mxu1 %v913_v6  ;;  %v919_v15 = vld [vmem:[%s1275_s13 + $0xa0] sm:$0xff]  ;;  %v918_v19 = vld [vmem:[%s1275_s13 + $0x98] sm:$0xff]  ;;  %v917_v23 = vld [vmem:[%s1275_s13 + $0x90] sm:$0xff] }
  0x37   : > { %591 = vmatpush.bf16.msra.mxu2 %v921_v7  ;;  %v927_v16 = vld [vmem:[%s1275_s13 + $0xe0] sm:$0xff]  ;;  %v926_v20 = vld [vmem:[%s1275_s13 + $0xd8] sm:$0xff]  ;;  %v925_v24 = vld [vmem:[%s1275_s13 + $0xd0] sm:$0xff] }
  0x38   : > { %605 = vmatpush.bf16.msra.mxu3 %v929_v8  ;;  %v900_v25 = vld [vmem:[%s1275_s13 + $0x8] sm:$0xff]  ;;  %v899_v29 = vld [vmem:[%s1275_s13] sm:$0xff]  ;;  %v897_v34 = vld [vmem:[%s1269_s11 + $0xc] sm:$0xf0] }
  0x39   : > { %564 = vmatpush.bf16.msra.mxu0 %v904_v9  ;;  %v908_v26 = vld [vmem:[%s1275_s13 + $0x48] sm:$0xff]  ;;  %v907_v30 = vld [vmem:[%s1275_s13 + $0x40] sm:$0xff]  ;;  %v748_v36 = vld [vmem:[%s1269_s11 + $0x10] sm:$0xf0] }
  0x3a   : > { %578 = vmatpush.bf16.msra.mxu1 %v912_v10  ;;  %v916_v27 = vld [vmem:[%s1275_s13 + $0x88] sm:$0xff]  ;;  %v915_v31 = vld [vmem:[%s1275_s13 + $0x80] sm:$0xff]  ;;  %v898_v38 = vld [vmem:[%s1269_s11 + $0x14] sm:$0xf0] }
  0x3b   : > { %592 = vmatpush.bf16.msra.mxu2 %v920_v11  ;;  %v924_v28 = vld [vmem:[%s1275_s13 + $0xc8] sm:$0xff]  ;;  %v923_v32 = vld [vmem:[%s1275_s13 + $0xc0] sm:$0xff]  ;;  %v756_v40 = vld [vmem:[%s1269_s11 + $0x18] sm:$0xf0] }
  0x3c   : > { %606 = vmatpush.bf16.msra.mxu3 %v928_v12  ;;  %v746_v33 = vld [vmem:[%s1269_s11] sm:$0xf]  ;;  %v895_v35 = vld [vmem:[%s1269_s11 + $0x4] sm:$0xf]  ;;  %v754_v37 = vld [vmem:[%s1269_s11 + $0x8] sm:$0xf] }
  0x3d   : > { %565 = vmatpush.bf16.msra.mxu0 %v903_v13  ;;  %v896_v39 = vld [vmem:[%s1269_s11 + $0xc] sm:$0xf]  ;;  %v747_v41 = vor.u32 %v897_v34, %v746_v33  ;;  %v751_v42 = vor.u32 %v895_v35, %v748_v36  ;;  %v755_v43 = vor.u32 %v898_v38, %v754_v37  ;;  %v280_v51 = vld [vmem:[#allocation2] sm:$0xff]  ;;  %v281_v59 = vld [vmem:[#allocation2 + $0x8] sm:$0xff] }
  0x3e   : > { %579 = vmatpush.bf16.msra.mxu1 %v911_v14  ;;  %v759_v44 = vor.u32 %v896_v39, %v756_v40 }
  0x3f   : > { %593 = vmatpush.bf16.msra.mxu2 %v919_v15 }
  0x40   : > { %607 = vmatpush.bf16.msra.mxu3 %v927_v16 }
  0x41   : > { %566 = vmatpush.bf16.msra.mxu0 %v902_v17 }
  0x42   : > { %580 = vmatpush.bf16.msra.mxu1 %v910_v18 }
  0x43   : > { %594 = vmatpush.bf16.msra.mxu2 %v918_v19 }
  0x44   : > { %608 = vmatpush.bf16.msra.mxu3 %v926_v20 }
  0x45   : > { %567 = vmatpush.bf16.msra.mxu0 %v901_v21 }
  0x46   : > { %581 = vmatpush.bf16.msra.mxu1 %v909_v22 }
  0x47   : > { %595 = vmatpush.bf16.msra.mxu2 %v917_v23 }
  0x48   : > { %609 = vmatpush.bf16.msra.mxu3 %v925_v24 }
  0x49   : > { %568 = vmatpush.bf16.msra.mxu0 %v900_v25 }
  0x4a   : > { %582 = vmatpush.bf16.msra.mxu1 %v908_v26 }
  0x4b   : > { %596 = vmatpush.bf16.msra.mxu2 %v916_v27 }
  0x4c   : > { %610 = vmatpush.bf16.msra.mxu3 %v924_v28 }
  0x4d   : > { %569 = vmatpush.bf16.msra.mxu0 %v899_v29 }
  0x4e   : > { %583 = vmatpush.bf16.msra.mxu1 %v907_v30 }
  0x4f   : > { %597 = vmatpush.bf16.msra.mxu2 %v915_v31 }
  0x50   : > { %611 = vmatpush.bf16.msra.mxu3 %v923_v32  ;;  %570 = vmatmul.bf16.vlgmr.msra.gmra.mxu0 %v747_v41 }
  0x51   : > { %584 = vmatmul.bf16.vlgmr.msra.gmra.mxu1 %v751_v42 }
  0x52   : > { %598 = vmatmul.bf16.vlgmr.msra.gmra.mxu2 %v755_v43 }
  0x53   : > { %612 = vmatmul.bf16.vlgmr.msra.gmra.mxu3 %v759_v44 }
  0xcd   : > { %v571_v45 = vpop.f32.mrf.mxu0 }
  0xce   : > { %v585_v46 = vpop.f32.mrf.mxu1 }
  0xcf   : > { %v586_v47 = vadd.f32 %v585_v46, %v571_v45 }
  0xd5   : > { %v599_v48 = vpop.f32.mrf.mxu2  ;;  %v573_v53 = vpop.f32.mrf.mxu0 }
  0xd6   : > { %v613_v49 = vpop.f32.mrf.mxu3  ;;  %v600_v50 = vadd.f32 %v599_v48, %v586_v47  ;;  %v587_v54 = vpop.f32.mrf.mxu1 }
  0xd7   : > { %v588_v56 = vadd.f32 %v587_v54, %v573_v53 }
  0xd8   : > { %v614_v52 = vadd.f32 %v613_v49, %v600_v50 }
  0xda   : > { %v618_v55 = vadd.f32 %v614_v52, %v280_v51 }
  0xdc   : > { %620 = vst [vmem:[#allocation2] sm:$0xff] %v618_v55 }
  0xdd   : > { %v601_v57 = vpop.f32.mrf.mxu2 }
  0xde   : > { %v602_v58 = vadd.f32 %v601_v57, %v588_v56  ;;  %v615_v60 = vpop.f32.mrf.mxu3 }
  0xe0   : > { %v616_v61 = vadd.f32 %v615_v60, %v602_v58  ;;  %625 = sbr.rel (%p888_p0) target bundleno = 237 (0xed), region = 52 }
  0xe2   : > { %v619_v62 = vadd.f32 %v616_v61, %v281_v59 }
  0xe4   : > { %621 = vst [vmem:[#allocation2 + $0x8] sm:$0xff] %v619_v62 }
  0xe5   : > { %v626_v63 = vld [vmem:[#allocation2] sm:$0xff] }
  0xe6   : > { %628 = vst [vmem:[#allocation8] sm:$0xff] %v626_v63 }
  0xeb   : > { %v627_v0 = vld [vmem:[#allocation2 + $0x8] sm:$0xff] }
  0xec   : > { %629 = vst [vmem:[#allocation8 + $0x8] sm:$0xff] %v627_v0 }
  0xed PF: > { %p947_p1 = scmp.eq.s32.totalorder %s731_s3, 1  ;;  %s640_s14 = sshll.u32 %s1350_s4, 4  ;;  %s641_s14 = int_to_ptr.hbm [resolvable:$true] %s640_s14 }
  0xee   : > { %s1160_s15 = smov [#allocation8]   ;;  %s1161_s22 = smov 128  }
  0xef   : > { %s638_s21 = sshll.u32 %s1160_s15, 4  ;;  %s1162_s23 = smov 8   ;;  %s639_s21 = int_to_ptr.vmem [resolvable:$true] %s638_s21 }
  0xf0   : > { %936 = dma.vmem_to_hbm [thread:$0]  (%p947_p1), %s639_s21, 256, %s641_s14, [#allocation5], %s1161_s22, %s1161_s22, %s1162_s23  }
  0xf1   : > { %1127 = dma.done.wait (%p947_p1), [#allocation5], 256  }
  0xf2   : > { %1129 = vsyncadd (%p947_p1), [#allocation5], 4294967040 }
  0xf3 PF: > { %s21_s19 = sadd.s32 1, %s1152_s19   ;;  %s1354_s15 = smov %s1136_s16 }
  0xf4   : > { %p18_p2 = scmp.ge.s32.totalorder %s21_s19, 4   ;;  %s1355_s16 = smov %s1140_s17 }
  0xf5   : > { %s1356_s17 = smov %s1239_s25  ;;  %s1357_s18 = smov %s1148_s2 }
  0xf6   : > { %s1358_s2 = smov %s1360_s20  ;;  %20 = sbr.rel (!%p18_p2) target bundleno = 7 (0x7), region = 95 }
  0xfb   :  { %657 = vsyncpa [#allocation4], 1 }
  0xfc   :  { %659 = vsyncpa [#allocation4 + $0x1], 1 }
  0xfd   :  { %660 = vsyncpa [#allocation7], 1 }
  0xfe   :  { %662 = vsyncpa [#allocation7 + $0x1], 1 }
  0xff   :  { %663 = vsyncpa [#allocation5], 1 }
 0x100   :  { %665 = vsyncpa [#allocation5 + $0x1], 1 }

</bundles_post_ra>
